<compile_context>
chip_gen: v7x
topology: tpu7x:2x2x1
jax: 0.10.0
libtpu: 0.0.40
codegen_flags: <defaults>
</compile_context>

<pallas_src>
import jax
import jax.numpy as jnp
from jax.experimental import pallas as pl
from jax.experimental.pallas import tpu as pltpu


def _pick_tile(dim, preferred, granule):
    """Largest multiple of `granule` that divides `dim` and is <= preferred.

    Falls back to the full dimension (always a legal block size) if no such
    multiple exists (e.g. tiny demo shapes).
    """
    best = None
    cap = min(dim, preferred)
    for cand in range(granule, cap + 1, granule):
        if dim % cand == 0:
            best = cand
    return best if best is not None else dim


def _cd_siamese_kernel(x0_ref, x1_ref, w_ref, b_ref, o_ref, acc_ref):
    k = pl.program_id(1)

    @pl.when(k == 0)
    def _init():
        acc_ref[...] = jnp.zeros_like(acc_ref)

    # abs-diff of the two (Identity) branch outputs for this (batch, D) tile.
    d = jnp.abs(x1_ref[...] - x0_ref[...]).astype(jnp.float32)        # (bt, tk)

    # Contract over this D tile: (bt, tk) x (num_classes, tk) -> (bt, num_classes)
    # via contraction on the last dims of both operands (A @ B.T).  Weight tile
    # stays lane-dense along D.
    acc_ref[...] += jax.lax.dot_general(
        d,
        w_ref[...].astype(jnp.float32),
        dimension_numbers=(((1,), (1,)), ((), ())),
        preferred_element_type=jnp.float32,
    )

    @pl.when(k == pl.num_programs(1) - 1)
    def _finalize():
        # Bias added once, only in the finalize branch.
        o_ref[...] = (acc_ref[...] + b_ref[...].astype(jnp.float32)).astype(o_ref.dtype)


def cd_siamese_apn_classifier(data0, data1, weight, bias, *, block_b=128, block_k=2048):
    """data0, data1: (B, C, H, W).  weight: (num_classes, D).  bias: (num_classes,)."""
    B, C, H, W = data0.shape
    D = C * H * W
    num_classes = weight.shape[0]

    # Identity branches (layer_branches=0); adaptive_avg_pool2d to (H, W) is a
    # no-op since the branch output already has spatial size (H, W).
    x0 = data0.reshape(B, D)            # torch.flatten(x, 1) on NCHW (row-major)
    x1 = data1.reshape(B, D)
    b2 = bias.reshape(1, num_classes)

    bt = _pick_tile(B, block_b, 8)      # batch tile (sublane granule 8, or full B)
    tk = _pick_tile(D, block_k, 128)    # reduction tile (lane granule 128, or full D)
    grid = (B // bt, D // tk)

    itemsize = jnp.dtype(data0.dtype).itemsize
    cost = pl.CostEstimate(
        flops=2 * B * D * num_classes,
        transcendentals=0,
        bytes_accessed=(2 * B * D) * itemsize
        + num_classes * D * jnp.dtype(weight.dtype).itemsize
        + B * num_classes * 4,
    )

    out = pl.pallas_call(
        _cd_siamese_kernel,
        out_shape=jax.ShapeDtypeStruct((B, num_classes), jnp.float32),
        grid_spec=pltpu.PrefetchScalarGridSpec(
            num_scalar_prefetch=0,
            grid=grid,
            in_specs=[
                pl.BlockSpec((bt, tk), lambda b, k: (b, k)),             # x0 tile
                pl.BlockSpec((bt, tk), lambda b, k: (b, k)),             # x1 tile
                pl.BlockSpec((num_classes, tk), lambda b, k: (0, k)),    # weight tile (lane-dense D)
                pl.BlockSpec((1, num_classes), lambda b, k: (0, 0)),     # bias (resident)
            ],
            out_specs=pl.BlockSpec((bt, num_classes), lambda b, k: (b, 0)),
            scratch_shapes=[pltpu.VMEM((bt, num_classes), jnp.float32)],
        ),
        compiler_params=pltpu.CompilerParams(
            dimension_semantics=("parallel", "arbitrary"),
        ),
        cost_estimate=cost,
    )(x0, x1, weight, b2)
    return out


if __name__ == "__main__":
    # Small deterministic example consistent with the module's forward:
    # two branches of NCHW inputs, a linear classifier on C*H*W features.
    B, C, H, W = 2, 4, 16, 16
    D = C * H * W
    num_classes = 2

    key = jax.random.PRNGKey(0)
    k0, k1, kw, kb = jax.random.split(key, 4)
    data0 = jax.random.normal(k0, (B, C, H, W), dtype=jnp.float32)
    data1 = jax.random.normal(k1, (B, C, H, W), dtype=jnp.float32)
    # Deterministic synthetic classifier parameters (nn.Linear(D, num_classes) shapes).
    weight = jax.random.normal(kw, (num_classes, D), dtype=jnp.float32) * 0.02
    bias = jax.random.normal(kb, (num_classes,), dtype=jnp.float32) * 0.01

    # block_k=256 at D=1024 exercises a 4-step pipelined reduction with the
    # accumulator init/finalize path (production defaults are block_k=2048).
    out = cd_siamese_apn_classifier(data0, data1, weight, bias, block_k=256)
    out = jax.block_until_ready(out)

    # Pure-JAX reference for sanity (same semantics as the PyTorch forward).
    ref = jnp.abs(data1 - data0).reshape(B, D) @ weight.T + bias
    assert out.shape == (B, num_classes)
    assert jnp.allclose(out, ref, atol=1e-4, rtol=1e-4)

    print("KERNEL_OK")
</pallas_src>

<mosaic_0001>
module attributes {stable_mosaic.version = 11 : i64} {
  func.func @_cd_siamese_kernel(%arg0: i32, %arg1: i32, %arg2: memref<2x256xf32, #tpu.memory_space<vmem>>, %arg3: memref<2x256xf32, #tpu.memory_space<vmem>>, %arg4: memref<2x256xf32, #tpu.memory_space<vmem>>, %arg5: memref<1x2xf32, #tpu.memory_space<vmem>>, %arg6: memref<2x2xf32, #tpu.memory_space<vmem>>, %arg7: memref<2x2xf32, #tpu.memory_space<vmem>>) attributes {dimension_semantics = [#tpu.dimension_semantics<parallel>, #tpu.dimension_semantics<arbitrary>], iteration_bounds = array<i64: 1, 4>, scalar_prefetch = 0 : i64, scratch_operands = 1 : i64, tpu.core_type = #tpu.core_type<tc>, window_params = [{transform_indices = @transform_0, window_bounds = array<i64: 2, 256>}, {transform_indices = @transform_1, window_bounds = array<i64: 2, 256>}, {transform_indices = @transform_2, window_bounds = array<i64: 2, 256>}, {pipeline_mode = #tpu.pipeline_mode<synchronous>, transform_indices = @transform_3, window_bounds = array<i64: 1, 2>}, {transform_indices = @transform_4, window_bounds = array<i64: 2, 2>}]} {
    %c0_i32 = arith.constant 0 : i32
    %0 = arith.cmpi eq, %arg1, %c0_i32 : i32
    %1 = arith.extui %0 : i1 to i32
    %c0_i32_0 = arith.constant 0 : i32
    %2 = arith.cmpi ne, %1, %c0_i32_0 : i32
    scf.if %2 {
      %cst_11 = arith.constant 0.000000e+00 : f32
      %15 = vector.broadcast %cst_11 : f32 to vector<2x2xf32>
      %c0_12 = arith.constant 0 : index
      %c0_13 = arith.constant 0 : index
      %16 = vector.load %arg7[%c0_12, %c0_13] : memref<2x2xf32, #tpu.memory_space<vmem>>, vector<2x2xf32>
      tpu.vector_store %arg7[%c0_12, %c0_13], %15 {strides = array<i32>} : memref<2x2xf32, #tpu.memory_space<vmem>>, vector<2x2xf32>,
    } else {
    }
    %c0 = arith.constant 0 : index
    %c0_1 = arith.constant 0 : index
    %3 = vector.load %arg3[%c0, %c0_1] : memref<2x256xf32, #tpu.memory_space<vmem>>, vector<2x256xf32>
    %c0_2 = arith.constant 0 : index
    %c0_3 = arith.constant 0 : index
    %4 = vector.load %arg2[%c0_2, %c0_3] : memref<2x256xf32, #tpu.memory_space<vmem>>, vector<2x256xf32>
    %5 = arith.subf %3, %4 : vector<2x256xf32>
    %6 = math.absf %5 : vector<2x256xf32>
    %c0_4 = arith.constant 0 : index
    %c0_5 = arith.constant 0 : index
    %7 = vector.load %arg7[%c0_4, %c0_5] : memref<2x2xf32, #tpu.memory_space<vmem>>, vector<2x2xf32>
    %c0_6 = arith.constant 0 : index
    %c0_7 = arith.constant 0 : index
    %8 = vector.load %arg4[%c0_6, %c0_7] : memref<2x256xf32, #tpu.memory_space<vmem>>, vector<2x256xf32>
    %cst = arith.constant dense<0.000000e+00> : vector<2x2xf32>
    %9 = tpu.matmul %6, %8, %cst {dimension_numbers = #tpu.dot_dimension_numbers<[1], [1], [0], [0], [0, 0, 1, 0], [], []>} : vector<2x256xf32>, vector<2x256xf32>, vector<2x2xf32> -> vector<2x2xf32>
    %10 = arith.addf %7, %9 : vector<2x2xf32>
    %c0_8 = arith.constant 0 : index
    %c0_9 = arith.constant 0 : index
    %11 = vector.load %arg7[%c0_8, %c0_9] : memref<2x2xf32, #tpu.memory_space<vmem>>, vector<2x2xf32>
    tpu.vector_store %arg7[%c0_8, %c0_9], %10 {strides = array<i32>} : memref<2x2xf32, #tpu.memory_space<vmem>>, vector<2x2xf32>,
    %c3_i32 = arith.constant 3 : i32
    %12 = arith.cmpi eq, %arg1, %c3_i32 : i32
    %13 = arith.extui %12 : i1 to i32
    %c0_i32_10 = arith.constant 0 : i32
    %14 = arith.cmpi ne, %13, %c0_i32_10 : i32
    scf.if %14 {
      %c0_11 = arith.constant 0 : index
      %c0_12 = arith.constant 0 : index
      %15 = vector.load %arg7[%c0_11, %c0_12] : memref<2x2xf32, #tpu.memory_space<vmem>>, vector<2x2xf32>
      %c0_13 = arith.constant 0 : index
      %c0_14 = arith.constant 0 : index
      %16 = vector.load %arg5[%c0_13, %c0_14] : memref<1x2xf32, #tpu.memory_space<vmem>>, vector<1x2xf32>
      %17 = vector.broadcast %16 : vector<1x2xf32> to vector<2x2xf32>
      %18 = arith.addf %15, %17 : vector<2x2xf32>
      %c0_15 = arith.constant 0 : index
      %c0_16 = arith.constant 0 : index
      %19 = vector.load %arg6[%c0_15, %c0_16] : memref<2x2xf32, #tpu.memory_space<vmem>>, vector<2x2xf32>
      tpu.vector_store %arg6[%c0_15, %c0_16], %18 {strides = array<i32>} : memref<2x2xf32, #tpu.memory_space<vmem>>, vector<2x2xf32>,
    } else {
    }
    return
  }
  func.func @transform_0(%arg0: i32, %arg1: i32) -> (i32, i32) {
    %c0_i32 = arith.constant 0 : i32
    return %arg0, %arg1 : i32, i32
  }
  func.func @transform_1(%arg0: i32, %arg1: i32) -> (i32, i32) {
    %c0_i32 = arith.constant 0 : i32
    return %arg0, %arg1 : i32, i32
  }
  func.func @transform_2(%arg0: i32, %arg1: i32) -> (i32, i32) {
    %c0_i32 = arith.constant 0 : i32
    %c0_i32_0 = arith.constant 0 : i32
    return %c0_i32, %arg1 : i32, i32
  }
  func.func @transform_3(%arg0: i32, %arg1: i32) -> (i32, i32) {
    %c0_i32 = arith.constant 0 : i32
    %c0_i32_0 = arith.constant 0 : i32
    %c0_i32_1 = arith.constant 0 : i32
    return %c0_i32, %c0_i32_0 : i32, i32
  }
  func.func @transform_4(%arg0: i32, %arg1: i32) -> (i32, i32) {
    %c0_i32 = arith.constant 0 : i32
    %c0_i32_0 = arith.constant 0 : i32
    return %arg0, %c0_i32 : i32, i32
  }
}

</mosaic_0001>

<bundles_post_ra>
// kernel: tpu_custom_call.1
= control target key start
LH: loop header
LB: loop body
LE: loop exit
PB: predicated region body
PF: predicated region fallthrough
CT: control target
= control target key end

     0   :  { %s1070_s0 = inlined_call_operand.hbm [shape: f32[2,1024], index: 0, kind: input, shape index: {}]   ;;  %s1071_s1 = inlined_call_operand.hbm [shape: f32[2,1024], index: 1, kind: input, shape index: {}]   ;;  %s1072_s2 = inlined_call_operand.hbm [shape: f32[2,1024], index: 2, kind: input, shape index: {}]   ;;  %s1073_s3 = inlined_call_operand.vmem [shape: f32[1,2], index: 3, kind: input, shape index: {}]   ;;  %s1074_s4 = inlined_call_operand.hbm [shape: f32[2,2], index: 4, kind: output, shape index: {}]  }
   0x1   :  { %1078 = sst [smem:[#allocation13_spill]] %s1071_s1 }
   0x2   :  { %9 = vsyncpa [#allocation4], 0 }
   0x3   :  { %11 = vsyncpa [#allocation4 + $0x1], 0 }
   0x4   :  { %12 = vsyncpa [#allocation7], 0 }
   0x5   :  { %14 = vsyncpa [#allocation7 + $0x1], 0 }
   0x6   :  { %15 = vsyncpa [#allocation5], 0  ;;  %s851_s15 = smov 0   ;;  %s853_s16 = smov 0  }
   0x7   :  { %s855_s17 = smov 0   ;;  %s857_s18 = smov 0  }
   0x8   :  { %s859_s19 = smov 0   ;;  %s861_s20 = smov 0  }
   0x9 LB: > { %s880_s21 = sadd.s32 4294967295, %s818_s20   ;;  %s30_s22 = sadd.s32 1, %s814_s19  ;;  %s818_s20 = sphi %s861_s20, %s21_s20   ;;  %s814_s19 = sphi %s859_s19, %s1093_s19   ;;  %s810_s18 = sphi %s857_s18, %s1092_s18   ;;  %s806_s17 = sphi %s855_s17, %s1091_s17   ;;  %s802_s16 = sphi %s853_s16, %s1090_s16   ;;  %s798_s15 = sphi %s851_s15, %s1089_s15  }
   0xa   : > { %p31_p0 = scmp.ge.s32.totalorder %s30_s22, 4  ;;  %s42_s23 = sadd.s32 1, %s806_s17 }
   0xb   : > { %p49_p1 = scmp.ne.s32.totalorder %s806_s17, %s802_s16  ;;  %p50_p2 = scmp.eq.s32.totalorder %s818_s20, 0 }
   0xc   : > { %s1095_s22 = smov (%p31_p0, %s30_s22), 0  ;;  %p55_p4 = scmp.ne.s32.totalorder %s802_s16, %s798_s15 }
   0xd   : > { %p51_p3 = por %p50_p2, %p49_p1  ;;  %s38_s24 = ssub.s32 %s814_s19, %s1095_s22 }
   0xe   : > { %p56_p5 = scmp.eq.s32.totalorder %s880_s21, 0  ;;  %p40_p6 = scmp.eq.s32.totalorder %s38_s24, 0 }
   0xf   : > { %p590_p8 = scmp.lt.s32.totalorder %s818_s20, 4  ;;  %s183_s27 = sand.u32 1, %s806_s17  }
  0x10   : > { %p893_p7 = por %p56_p5, %p55_p4  ;;  %s903_s28 = sshll.u32 %s814_s19, 6 }
  0x11   : > { %s899_s26 = scalar_select %p40_p6, %s806_s17, %s42_s23  }
  0x12   : > { %s1079_s25 = scalar_select %p893_p7, 1, 0 }
  0x13   : > { %s907_s29 = sshll.u32 %s183_s27, 2  ;;  %p909_p9 = pnand %p590_p8, %p51_p3 }
  0x14   : > { %s204_s5 = sand.u32 1, %s818_s20   ;;  %s1081_s1 = sld [smem:[#allocation13_spill]] }
  0x15   : > { %s1080_s30 = scalar_select %p909_p9, 1, 0 }
  0x16   : > { %s208_s9 = scalar_lea.vmem [#allocation6], %s907_s29  ;;  %s924_s11 = scalar_lea.sflag [#allocation7], %s204_s5 }
  0x17   : > { %s218_s10 = sshll.u32 %s208_s9, 4  ;;  %p930_p12 = pneg %p909_p9  ;;  %s921_s10 = int_to_ptr.vmem [resolvable:$true] %s218_s10 }
  0x1a   : > { %s918_s8 = scalar_lea.hbm %s1081_s1, %s903_s28  ;;  %s649_s23 = scalar_lea.hbm %s1081_s1, 256 }
  0x1b   : > { %s644_s12 = scalar_lea.hbm %s918_s8, 64  ;;  %p650_p1 = scmp.lt.u32.totalorder %s918_s8, %s1081_s1 }
  0x1c   : > { %p645_p11 = scmp.ne.s32.totalorder %s918_s8, %s644_s12  ;;  %p651_p2 = scmp.lt.u32.totalorder %s649_s23, %s644_s12 }
  0x1d   : > { %p653_p4 = scmp.lt.u32.totalorder %s644_s12, %s918_s8 }
  0x1e   : > { %p647_p13 = pnand %p930_p12, %p645_p11  ;;  %p652_p3 = por %p651_p2, %p650_p1 }
  0x20   : > { %p648_p0 = pneg %p647_p13  ;;  %p654_p5 = por %p653_p4, %p652_p3 }
  0x22   : > { %p655_p6 = pnand %p654_p5, %p648_p0 }
  0x24   : > { %658 = shalt.err (!%p655_p6)
}
  0x25   : > { %s659_s5 = scalar_lea.vmem %s921_s10, 64  ;;  %s820_s7 = smov [#allocation6]  }
  0x26   : > { %p660_p8 = scmp.ne.s32.totalorder %s921_s10, %s659_s5  ;;  %s664_s9 = sshll.u32 %s820_s7, 4  ;;  %s665_s9 = int_to_ptr.vmem [resolvable:$false] %s664_s9 }
  0x27   : > { %s666_s14 = scalar_lea.vmem %s665_s9, 128  ;;  %p667_p10 = scmp.lt.s32.totalorder %s921_s10, %s665_s9 }
  0x28   : > { %p662_p11 = pnand %p660_p8, %p930_p12  ;;  %p668_p7 = scmp.lt.s32.totalorder %s666_s14, %s659_s5 }
  0x2a   : > { %p663_p13 = pneg %p662_p11  ;;  %p669_p1 = por %p668_p7, %p667_p10 }
  0x2c   : > { %p670_p2 = pnand %p669_p1, %p663_p13 }
  0x2e   : > { %673 = shalt.err (!%p670_p2)
}
  0x2f   : > { %586 = dma.hbm_to_vmem [thread:$0]  (!%p909_p9), %s918_s8, 64, %s921_s10, %s924_s11  }
  0x30   : > { %p242_p0 = scmp.lt.s32.totalorder %s818_s20, 5  ;;  %p1083_p3 = scmp.ge.s32.totalorder %s818_s20, 1 }
  0x31   : > { %s965_s24 = scalar_lea.hbm %s1070_s0, %s903_s28  ;;  %s187_s6 = scalar_lea.vmem [#allocation3], %s907_s29 }
  0x32   : > { %p957_p4 = pnand %p1083_p3, %p242_p0  ;;  %s197_s5 = sshll.u32 %s187_s6, 4  ;;  %s198_s5 = int_to_ptr.vmem [resolvable:$true] %s197_s5 }
  0x33   : > { %s184_s8 = scalar_lea.sflag [#allocation4], %s183_s27  ;;  %s674_s10 = scalar_lea.hbm %s965_s24, 64 }
  0x34   : > { %s1084_s12 = scalar_select %p957_p4, 1, 0 }
  0x35   : > { %p675_p7 = scmp.ne.s32.totalorder %s965_s24, %s674_s10  ;;  %s679_s14 = scalar_lea.hbm %s1070_s0, 256 }
  0x36   : > { %p680_p6 = scmp.lt.u32.totalorder %s965_s24, %s1070_s0  ;;  %p681_p8 = scmp.lt.u32.totalorder %s679_s14, %s674_s10 }
  0x37   : > { %p677_p10 = pnand %p675_p7, %p930_p12  ;;  %p683_p13 = scmp.lt.u32.totalorder %s674_s10, %s965_s24 }
  0x38   : > { %p682_p11 = por %p681_p8, %p680_p6 }
  0x39   : > { %p678_p5 = pneg %p677_p10 }
  0x3a   : > { %p684_p1 = por %p683_p13, %p682_p11 }
  0x3c   : > { %p685_p2 = pnand %p684_p1, %p678_p5 }
  0x3e   : > { %688 = shalt.err (!%p685_p2)
}
  0x3f   : > { %s689_s27 = scalar_lea.vmem %s198_s5, 64  ;;  %s821_s6 = smov [#allocation3]  }
  0x40   : > { %p690_p0 = scmp.ne.s32.totalorder %s198_s5, %s689_s27  ;;  %s694_s1 = sshll.u32 %s821_s6, 4  ;;  %s695_s1 = int_to_ptr.vmem [resolvable:$false] %s694_s1 }
  0x41   : > { %s696_s7 = scalar_lea.vmem %s695_s1, 128  ;;  %p697_p10 = scmp.lt.s32.totalorder %s198_s5, %s695_s1 }
  0x42   : > { %p692_p3 = pnand %p690_p0, %p930_p12  ;;  %p698_p4 = scmp.lt.s32.totalorder %s696_s7, %s689_s27 }
  0x44   : > { %p693_p7 = pneg %p692_p3  ;;  %p699_p9 = por %p698_p4, %p697_p10 }
  0x46   : > { %p700_p6 = pnand %p699_p9, %p693_p7 }
  0x48   : > { %703 = shalt.err (!%p700_p6)
}
  0x49   : > { %p1085_p8 = scmp.ne.s32.totalorder %s1080_s30, 0  ;;  %s991_s14 = scalar_lea.hbm %s1072_s2, %s903_s28 }
  0x4a   : > { %s229_s1 = scalar_lea.vmem [#allocation8], %s907_s29  ;;  %s704_s23 = scalar_lea.hbm %s991_s14, 64 }
  0x4b   : > { %583 = dma.hbm_to_vmem [thread:$0]  (!%p1085_p8), %s965_s24, 64, %s198_s5, %s184_s8  }
  0x4c   : > { %s237_s15 = sshll.u32 %s229_s1, 4  ;;  %p705_p9 = scmp.ne.s32.totalorder %s991_s14, %s704_s23  ;;  %s238_s15 = int_to_ptr.vmem [resolvable:$true] %s237_s15 }
  0x4d   : > { %s709_s24 = scalar_lea.hbm %s1072_s2, 256  ;;  %p710_p11 = scmp.lt.u32.totalorder %s991_s14, %s1072_s2 }
  0x4e   : > { %p707_p4 = pnand %p705_p9, %p930_p12  ;;  %p711_p13 = scmp.lt.u32.totalorder %s709_s24, %s704_s23 }
  0x4f   : > { %p713_p2 = scmp.lt.u32.totalorder %s704_s23, %s991_s14 }
  0x50   : > { %p708_p5 = pneg %p707_p4  ;;  %p712_p1 = por %p711_p13, %p710_p11 }
  0x52   : > { %p714_p0 = por %p713_p2, %p712_p1 }
  0x54   : > { %p715_p3 = pnand %p714_p0, %p708_p5 }
  0x56   : > { %718 = shalt.err (!%p715_p3)
}
  0x57   : > { %s719_s28 = scalar_lea.vmem %s238_s15, 64  ;;  %s822_s29 = smov [#allocation8]  }
  0x58   : > { %p720_p7 = scmp.ne.s32.totalorder %s238_s15, %s719_s28  ;;  %s724_s7 = sshll.u32 %s822_s29, 4  ;;  %s725_s7 = int_to_ptr.vmem [resolvable:$false] %s724_s7 }
  0x59   : > { %s726_s10 = scalar_lea.vmem %s725_s7, 128  ;;  %p727_p9 = scmp.lt.s32.totalorder %s238_s15, %s725_s7 }
  0x5a   : > { %p722_p10 = pnand %p720_p7, %p930_p12  ;;  %p728_p4 = scmp.lt.s32.totalorder %s726_s10, %s719_s28 }
  0x5c   : > { %p723_p6 = pneg %p722_p10  ;;  %p729_p8 = por %p728_p4, %p727_p9 }
  0x5e   : > { %p730_p11 = pnand %p729_p8, %p723_p6 }
  0x60   : > { %733 = shalt.err (!%p730_p11)
}
  0x61   : > { %p1086_p13 = scmp.ne.s32.totalorder %s1080_s30, 0  ;;  %p1087_p5 = scmp.ne.s32.totalorder %s1084_s12, 0 }
  0x62   : > { %s248_s13 = sand.u32 (!%p1087_p5), 1, %s802_s16   ;;  %p1088_p12 = scmp.ne.s32.totalorder (!%p1087_p5), %s1079_s25, 0 }
  0x63   : > { %589 = dma.hbm_to_vmem [thread:$0]  (!%p1086_p13), %s991_s14, 64, %s238_s15, %s924_s11  }
  0x64   : > { %246 = sbr.rel (%p1087_p5) target bundleno = 383 (0x17f), region = 36  ;;  %s556_s9 = sshll.u32 (!%p1087_p5), %s248_s13, 2 }
  0x65   : > { %s249_s1 = scalar_lea.sflag (!%p1087_p5), [#allocation4], %s248_s13  ;;  %s252_s23 = scalar_lea.vmem (!%p1087_p5), [#allocation3], %s556_s9 }
  0x6b   : > { %785 = dma.done.wait (%p1088_p12), %s249_s1, 64  }
  0x6c   : > { %787 = vsyncadd (%p1088_p12), %s249_s1, 4294967232  ;;  %s257_s30 = sand.u32 1, %s880_s21   ;;  %s261_s6 = scalar_lea.vmem [#allocation6], %s556_s9 }
  0x6d   : > { %s258_s27 = scalar_lea.sflag [#allocation7], %s257_s30 }
  0x6e   : > { %789 = dma.done.wait (%p1088_p12), %s258_s27, 128  }
  0x6f   : > { %791 = vsyncadd (%p1088_p12), %s258_s27, 4294967168  ;;  %s270_s11 = scalar_lea.vmem [#allocation8], %s556_s9  ;;  %p559_p8 = scmp.ne.s32.totalorder %s810_s18, 0 }
  0x70   : > { %vm307_vm0 = vcmask (!%p559_p8), 9216   ;;  %v823_v0 = vmov (!%p559_p8), 0.0  }
  0x71   : > { %306 = sbr.rel (%p559_p8) target bundleno = 120 (0x78), region = 52  ;;  %308 = vst.msk [vmem:[#allocation2] sm:$0x3] (!%p559_p8), %vm307_vm0, %v823_v0 }
  0x78 PF: > { %v560_v1 = vld.sshfl [vmem:[%s270_s11] sm:$0x33 pattern:$0x76325410]  ;;  %v309_v2 = vld [vmem:[%s261_s6] sm:$0xf]  ;;  %v319_v3 = vlaneseq }
  0x79   : > { %v334_v4 = vcombine.high %v560_v1, %v560_v1  ;;  %v310_v5 = vld [vmem:[%s252_s23] sm:$0xf]  ;;  %v824_v7 = vmov 1983009808   ;;  %v313_v15 = vld [vmem:[#allocation2] sm:$0x3] }
  0x7a   : > { %v311_v6 = vsub.f32 %v309_v2, %v310_v5  ;;  %v317_v8 = vunpack.c.l.s4 %v824_v7  ;;  %v320_v9 = vshrl.u32 %v319_v3, 7  ;;  %vm408_vm1 = vcmask 9216   ;;  %p561_p1 = scmp.ne.s32.totalorder %s810_s18, 3 }
  0x7b   : > { %337 = vmatprep.subr.mxu0 %v334_v4  ;;  %v562_v20 = vld [vmem:[%s1073_s3] ss:$0 sm:$0xff] (!%p561_p1) }
  0x7c   : > { %338 = vmatpush1.xpose.msra.mxu0 %v560_v1  ;;  %v312_v10 = vand.u32 2147483647, %v311_v6  ;;  %v318_v11 = vunpack.c.0.s8 %v317_v8 }
  0x7e   : > { %v321_v12 = vsub.s32 %v318_v11, %v320_v9 }
  0x80   : > { %v322_v13 = vrot.slane %v312_v10, %v321_v12 }
  0x82   : > { %v323_v14 = vcombine.high %v322_v13, %v322_v13 }
  0x84   : > { %401 = vmatprep.mubr.f32.mxu0 %v323_v14 }
  0x85   : > { %402 = vmatmul.mubr.f32.vlgmr.msra.gmra.mrb[0].mxu0 %v322_v13 }
 0x155   : > { %413 = sbr.rel (%p561_p1) target bundleno = 358 (0x166), region = 56 }
 0x158   : > { %v403_v16 = vpop.f32.mrb[0].mxu0 }
 0x159   : > { %v407_v17 = vadd.f32 %v403_v16, %v313_v15  ;;  %v405_v18 = vpop.f32.mrb[1].mxu0 }
 0x15b   : > { %409 = vst.msk [vmem:[#allocation2] sm:$0x3] %vm408_vm1, %v407_v17 }
 0x162   : > { %v414_v19 = vld [vmem:[#allocation2] sm:$0x3] }
 0x163   : > { %v422_v21 = vadd.f32 %v562_v20, %v414_v19 }
 0x165   : > { %423 = vst.msk [vmem:[#allocation9] sm:$0x3] %vm408_vm1, %v422_v21 }
 0x166 PF: > { %p591_p2 = scmp.eq.s32.totalorder %s880_s21, 3  ;;  %s825_s14 = smov [#allocation9]  }
 0x167   : > { %s433_s15 = sshll.u32 %s825_s14, 4  ;;  %s434_s15 = int_to_ptr.vmem [resolvable:$true] %s433_s15 }
 0x168   : > { %s734_s24 = scalar_lea.vmem %s434_s15, 32  ;;  %p741_p10 = scmp.lt.s32.totalorder %s434_s15, %s434_s15 }
 0x169   : > { %p735_p0 = scmp.ne.s32.totalorder %s434_s15, %s734_s24  ;;  %p742_p6 = scmp.lt.s32.totalorder %s734_s24, %s734_s24 }
 0x16b   : > { %p736_p3 = pnand %p735_p0, %p591_p2  ;;  %p743_p9 = por %p742_p6, %p741_p10 }
 0x16d   : > { %p737_p7 = pneg %p736_p3 }
 0x16f   : > { %p744_p4 = pnand %p743_p9, %p737_p7 }
 0x171   : > { %747 = shalt.err (!%p744_p4)
}
 0x172   : > { %s748_s8 = scalar_lea.hbm %s1074_s4, 32 }
 0x173   : > { %p749_p11 = scmp.ne.s32.totalorder %s1074_s4, %s748_s8  ;;  %p754_p12 = scmp.lt.u32.totalorder %s748_s8, %s1074_s4 }
 0x175   : > { %p750_p13 = pnand %p749_p11, %p591_p2 }
 0x177   : > { %p751_p5 = pneg %p750_p13 }
 0x179   : > { %p756_p8 = pnand %p754_p12, %p751_p5 }
 0x17b   : > { %759 = shalt.err (!%p756_p8)
}
 0x17c   : > { %577 = dma.vmem_to_hbm [thread:$0]  (%p591_p2), %s434_s15, 32, %s1074_s4, [#allocation5]  }
 0x17d   : > { %793 = dma.done.wait (%p591_p2), [#allocation5], 32  }
 0x17e   : > { %795 = vsyncadd (%p591_p2), [#allocation5], 4294967264 }
 0x17f PF: > { %s21_s20 = sadd.s32 1, %s818_s20   ;;  %s1089_s15 = smov %s802_s16 }
 0x180   : > { %p18_p1 = scmp.ge.s32.totalorder %s21_s20, 6   ;;  %s1090_s16 = smov %s806_s17 }
 0x181   : > { %s1091_s17 = smov %s899_s26  ;;  %s1092_s18 = smov %s814_s19 }
 0x182   : > { %s1093_s19 = smov %s1095_s22  ;;  %20 = sbr.rel (!%p18_p1) target bundleno = 9 (0x9), region = 106 }
 0x189   :  { %446 = vsyncpa [#allocation4], 1 }
 0x18a   :  { %448 = vsyncpa [#allocation4 + $0x1], 1 }
 0x18b   :  { %449 = vsyncpa [#allocation7], 1 }
 0x18c   :  { %451 = vsyncpa [#allocation7 + $0x1], 1 }
 0x18d   :  { %452 = vsyncpa [#allocation5], 1 }
 0x18e   :  { %454 = vsyncpa [#allocation5 + $0x1], 1 }

</bundles_post_ra>
